<compile_context>
chip_gen: v7x
topology: tpu7x:2x2x1
jax: 0.10.0
libtpu: 0.0.40
codegen_flags: <defaults>
</compile_context>

<pallas_src>
import math
import jax
import jax.numpy as jnp
from jax.experimental import pallas as pl
from jax.experimental.pallas import tpu as pltpu


def _round_up(n, m):
    return ((n + m - 1) // m) * m


def _cdiv(a, b):
    return -(-a // b)


def dqn_kernel(x_ref, w1_ref, b1_ref, w2_ref, b2_ref, w3_ref, b3_ref, o_ref):
    # x streamed per batch tile (f32 in HBM, cast to bf16 here).  Weights are
    # bf16, resident in VMEM across the whole grid (constant index maps).
    x = x_ref[...].astype(jnp.bfloat16)                                        # (TILE_B, IN)
    h1 = jnp.dot(x, w1_ref[...], preferred_element_type=jnp.float32) + b1_ref[...]
    h1 = jnp.maximum(h1, 0.0).astype(jnp.bfloat16)                             # (TILE_B, H)
    h2 = jnp.dot(h1, w2_ref[...], preferred_element_type=jnp.float32) + b2_ref[...]
    h2 = jnp.maximum(h2, 0.0).astype(jnp.bfloat16)                             # (TILE_B, H)
    out = jnp.dot(h2, w3_ref[...], preferred_element_type=jnp.float32) + b3_ref[...]
    o_ref[...] = out.astype(o_ref.dtype)                                       # (TILE_B, OUT) f32


def prepare_params(w1, b1, w2, b2, w3, b3):
    """One-time parameter prep: weights -> bf16, biases -> f32 row vectors.

    Call once at init (or after each optimizer step), NOT per forward -- the
    per-call pad/cast kernels dominated the previous version's wall time.
    Weight layout is [in_features, out_features], so each layer computes
    x @ W + b (== PyTorch's x @ W.T + b with W of shape [out, in]).
    """
    as_row = lambda b: b.reshape(1, -1).astype(jnp.float32)
    return (w1.astype(jnp.bfloat16), as_row(b1),
            w2.astype(jnp.bfloat16), as_row(b2),
            w3.astype(jnp.bfloat16), as_row(b3))


def _pick_batch_tiling(B, target_tile, min_steps):
    # Fewer, bigger steps (per-step overhead ~0.35us dwarfs per-step compute),
    # while keeping batch-padding waste < 8 rows per step.
    bp8 = _round_up(B, 8)
    num_steps = max(min_steps, _cdiv(bp8, target_tile))
    tile_b = _round_up(_cdiv(bp8, num_steps), 8)
    bp = num_steps * tile_b
    return tile_b, bp, num_steps


def dqn_forward(x, params, *, target_tile=512, min_steps=1):
    """Forward pass. x: (B, in) f32, params from prepare_params(). Returns (B, out) f32.

    Use min_steps=2 on v7x so the "parallel" batch axis is shared by both TensorCores.
    """
    w1, b1, w2, b2, w3, b3 = params
    B, in_size = x.shape
    hidden = w1.shape[1]
    out_size = w3.shape[1]

    tile_b, bp, num_steps = _pick_batch_tiling(B, target_tile, min_steps)

    # Only pad the batch axis, and only when the chosen tiling requires it
    # (at most 8*num_steps - 1 rows; zero for batch a multiple of tile_b).
    xp = x if bp == B else jnp.pad(x, ((0, bp - B), (0, 0)))

    resident = lambda shape: pl.BlockSpec(shape, lambda i: (0, 0))  # stays in VMEM across grid

    flops = 2 * bp * (in_size * hidden + hidden * hidden + hidden * out_size)
    bytes_accessed = (
        xp.size * xp.dtype.itemsize
        + sum(a.size * a.dtype.itemsize for a in (w1, b1, w2, b2, w3, b3))
        + bp * out_size * 4
    )

    out = pl.pallas_call(
        dqn_kernel,
        out_shape=jax.ShapeDtypeStruct((bp, out_size), jnp.float32),
        grid=(num_steps,),
        in_specs=[
            pl.BlockSpec((tile_b, in_size), lambda i: (i, 0)),        # x: batch-tiled
            resident((in_size, hidden)), resident((1, hidden)),       # w1, b1
            resident((hidden, hidden)), resident((1, hidden)),        # w2, b2
            resident((hidden, out_size)), resident((1, out_size)),    # w3, b3
        ],
        out_specs=pl.BlockSpec((tile_b, out_size), lambda i: (i, 0)), # out: batch-tiled, no padding
        compiler_params=pltpu.CompilerParams(
            dimension_semantics=("parallel",),                        # shard batch across TCs (v7x)
        ),
        cost_estimate=pl.CostEstimate(
            flops=flops, transcendentals=0, bytes_accessed=bytes_accessed),
    )(xp, w1, b1, w2, b2, w3, b3)

    return out if bp == B else out[:B]


def init_linear_params(key, in_features, out_features):
    # Mimic PyTorch nn.Linear default init: U(-1/sqrt(fan_in), 1/sqrt(fan_in)).
    kw, kb = jax.random.split(key)
    bound = 1.0 / math.sqrt(in_features)
    w = jax.random.uniform(kw, (in_features, out_features), jnp.float32, -bound, bound)
    b = jax.random.uniform(kb, (out_features,), jnp.float32, -bound, bound)
    return w, b


if __name__ == "__main__":
    # Small, module-consistent shapes: flat feature input -> 256 -> 256 -> output_size.
    # batch=24 with target_tile=8 / min_steps=2 gives a 3-step batch-tiled grid
    # (tile_b=8, no batch padding) to exercise the streaming path at a tiny size.
    batch = 24
    input_size = 64
    hidden = 256
    output_size = 16

    key = jax.random.PRNGKey(0)
    kx, k1, k2, k3 = jax.random.split(key, 4)

    x = jax.random.normal(kx, (batch, input_size), jnp.float32)
    w1, b1 = init_linear_params(k1, input_size, hidden)
    w2, b2 = init_linear_params(k2, hidden, hidden)
    w3, b3 = init_linear_params(k3, hidden, output_size)

    # One-time parameter prep (would be done at DQN construction / after updates).
    params = prepare_params(w1, b1, w2, b2, w3, b3)

    out = dqn_forward(x, params, target_tile=8, min_steps=2)
    out = jax.block_until_ready(out)

    # Reference check in plain JAX f32 (same semantics as the PyTorch forward).
    # Tolerance relaxed because the kernel runs the matmuls with bf16 inputs.
    ref = jnp.maximum(x @ w1 + b1, 0.0)
    ref = jnp.maximum(ref @ w2 + b2, 0.0)
    ref = ref @ w3 + b3

    assert out.shape == (batch, output_size)
    assert jnp.allclose(out, ref, atol=5e-2, rtol=5e-2), float(jnp.max(jnp.abs(out - ref)))

    print("KERNEL_OK")
</pallas_src>

<mosaic_0001>
module attributes {stable_mosaic.version = 11 : i64} {
  func.func @dqn_kernel(%arg0: i32, %arg1: memref<8x64xf32, #tpu.memory_space<vmem>>, %arg2: memref<64x256xbf16, #tpu.memory_space<vmem>>, %arg3: memref<1x256xf32, #tpu.memory_space<vmem>>, %arg4: memref<256x256xbf16, #tpu.memory_space<vmem>>, %arg5: memref<1x256xf32, #tpu.memory_space<vmem>>, %arg6: memref<256x16xbf16, #tpu.memory_space<vmem>>, %arg7: memref<1x16xf32, #tpu.memory_space<vmem>>, %arg8: memref<8x16xf32, #tpu.memory_space<vmem>>) attributes {dimension_semantics = [#tpu.dimension_semantics<parallel>], iteration_bounds = array<i64: 3>, scalar_prefetch = 0 : i64, scratch_operands = 0 : i64, tpu.core_type = #tpu.core_type<tc>, window_params = [{transform_indices = @transform_0, window_bounds = array<i64: 8, 64>}, {pipeline_mode = #tpu.pipeline_mode<synchronous>, transform_indices = @transform_1, window_bounds = array<i64: 64, 256>}, {pipeline_mode = #tpu.pipeline_mode<synchronous>, transform_indices = @transform_2, window_bounds = array<i64: 1, 256>}, {pipeline_mode = #tpu.pipeline_mode<synchronous>, transform_indices = @transform_3, window_bounds = array<i64: 256, 256>}, {pipeline_mode = #tpu.pipeline_mode<synchronous>, transform_indices = @transform_4, window_bounds = array<i64: 1, 256>}, {pipeline_mode = #tpu.pipeline_mode<synchronous>, transform_indices = @transform_5, window_bounds = array<i64: 256, 16>}, {pipeline_mode = #tpu.pipeline_mode<synchronous>, transform_indices = @transform_6, window_bounds = array<i64: 1, 16>}, {transform_indices = @transform_7, window_bounds = array<i64: 8, 16>}]} {
    %c0 = arith.constant 0 : index
    %c0_0 = arith.constant 0 : index
    %0 = vector.load %arg1[%c0, %c0_0] : memref<8x64xf32, #tpu.memory_space<vmem>>, vector<8x64xf32>
    %1 = arith.truncf %0 : vector<8x64xf32> to vector<8x64xbf16>
    %c0_1 = arith.constant 0 : index
    %c0_2 = arith.constant 0 : index
    %2 = vector.load %arg2[%c0_1, %c0_2] : memref<64x256xbf16, #tpu.memory_space<vmem>>, vector<64x256xbf16>
    %cst = arith.constant dense<0.000000e+00> : vector<8x256xf32>
    %3 = tpu.matmul %1, %2, %cst {dimension_numbers = #tpu.dot_dimension_numbers<[1], [0], [0], [1], [0, 0, 1, 1], [], []>} : vector<8x64xbf16>, vector<64x256xbf16>, vector<8x256xf32> -> vector<8x256xf32>
    %c0_3 = arith.constant 0 : index
    %c0_4 = arith.constant 0 : index
    %4 = vector.load %arg3[%c0_3, %c0_4] : memref<1x256xf32, #tpu.memory_space<vmem>>, vector<1x256xf32>
    %5 = vector.broadcast %4 : vector<1x256xf32> to vector<8x256xf32>
    %6 = arith.addf %3, %5 : vector<8x256xf32>
    %cst_5 = arith.constant 0.000000e+00 : f32
    %7 = vector.broadcast %cst_5 : f32 to vector<8x256xf32>
    %8 = arith.maximumf %6, %7 : vector<8x256xf32>
    %9 = arith.truncf %8 : vector<8x256xf32> to vector<8x256xbf16>
    %c0_6 = arith.constant 0 : index
    %c0_7 = arith.constant 0 : index
    %10 = vector.load %arg4[%c0_6, %c0_7] : memref<256x256xbf16, #tpu.memory_space<vmem>>, vector<256x256xbf16>
    %cst_8 = arith.constant dense<0.000000e+00> : vector<8x256xf32>
    %11 = tpu.matmul %9, %10, %cst_8 {dimension_numbers = #tpu.dot_dimension_numbers<[1], [0], [0], [1], [0, 0, 1, 1], [], []>} : vector<8x256xbf16>, vector<256x256xbf16>, vector<8x256xf32> -> vector<8x256xf32>
    %c0_9 = arith.constant 0 : index
    %c0_10 = arith.constant 0 : index
    %12 = vector.load %arg5[%c0_9, %c0_10] : memref<1x256xf32, #tpu.memory_space<vmem>>, vector<1x256xf32>
    %13 = vector.broadcast %12 : vector<1x256xf32> to vector<8x256xf32>
    %14 = arith.addf %11, %13 : vector<8x256xf32>
    %cst_11 = arith.constant 0.000000e+00 : f32
    %15 = vector.broadcast %cst_11 : f32 to vector<8x256xf32>
    %16 = arith.maximumf %14, %15 : vector<8x256xf32>
    %17 = arith.truncf %16 : vector<8x256xf32> to vector<8x256xbf16>
    %c0_12 = arith.constant 0 : index
    %c0_13 = arith.constant 0 : index
    %18 = vector.load %arg6[%c0_12, %c0_13] : memref<256x16xbf16, #tpu.memory_space<vmem>>, vector<256x16xbf16>
    %cst_14 = arith.constant dense<0.000000e+00> : vector<8x16xf32>
    %19 = tpu.matmul %17, %18, %cst_14 {dimension_numbers = #tpu.dot_dimension_numbers<[1], [0], [0], [1], [0, 0, 1, 1], [], []>} : vector<8x256xbf16>, vector<256x16xbf16>, vector<8x16xf32> -> vector<8x16xf32>
    %c0_15 = arith.constant 0 : index
    %c0_16 = arith.constant 0 : index
    %20 = vector.load %arg7[%c0_15, %c0_16] : memref<1x16xf32, #tpu.memory_space<vmem>>, vector<1x16xf32>
    %21 = vector.broadcast %20 : vector<1x16xf32> to vector<8x16xf32>
    %22 = arith.addf %19, %21 : vector<8x16xf32>
    %c0_17 = arith.constant 0 : index
    %c0_18 = arith.constant 0 : index
    %23 = vector.load %arg8[%c0_17, %c0_18] : memref<8x16xf32, #tpu.memory_space<vmem>>, vector<8x16xf32>
    tpu.vector_store %arg8[%c0_17, %c0_18], %22 {strides = array<i32>} : memref<8x16xf32, #tpu.memory_space<vmem>>, vector<8x16xf32>,
    return
  }
  func.func @transform_0(%arg0: i32) -> (i32, i32) {
    %c0_i32 = arith.constant 0 : i32
    %c0_i32_0 = arith.constant 0 : i32
    return %arg0, %c0_i32 : i32, i32
  }
  func.func @transform_1(%arg0: i32) -> (i32, i32) {
    %c0_i32 = arith.constant 0 : i32
    %c0_i32_0 = arith.constant 0 : i32
    %c0_i32_1 = arith.constant 0 : i32
    return %c0_i32, %c0_i32_0 : i32, i32
  }
  func.func @transform_2(%arg0: i32) -> (i32, i32) {
    %c0_i32 = arith.constant 0 : i32
    %c0_i32_0 = arith.constant 0 : i32
    %c0_i32_1 = arith.constant 0 : i32
    return %c0_i32, %c0_i32_0 : i32, i32
  }
  func.func @transform_3(%arg0: i32) -> (i32, i32) {
    %c0_i32 = arith.constant 0 : i32
    %c0_i32_0 = arith.constant 0 : i32
    %c0_i32_1 = arith.constant 0 : i32
    return %c0_i32, %c0_i32_0 : i32, i32
  }
  func.func @transform_4(%arg0: i32) -> (i32, i32) {
    %c0_i32 = arith.constant 0 : i32
    %c0_i32_0 = arith.constant 0 : i32
    %c0_i32_1 = arith.constant 0 : i32
    return %c0_i32, %c0_i32_0 : i32, i32
  }
  func.func @transform_5(%arg0: i32) -> (i32, i32) {
    %c0_i32 = arith.constant 0 : i32
    %c0_i32_0 = arith.constant 0 : i32
    %c0_i32_1 = arith.constant 0 : i32
    return %c0_i32, %c0_i32_0 : i32, i32
  }
  func.func @transform_6(%arg0: i32) -> (i32, i32) {
    %c0_i32 = arith.constant 0 : i32
    %c0_i32_0 = arith.constant 0 : i32
    %c0_i32_1 = arith.constant 0 : i32
    return %c0_i32, %c0_i32_0 : i32, i32
  }
  func.func @transform_7(%arg0: i32) -> (i32, i32) {
    %c0_i32 = arith.constant 0 : i32
    %c0_i32_0 = arith.constant 0 : i32
    return %arg0, %c0_i32 : i32, i32
  }
}

</mosaic_0001>

<bundles_post_ra>
// kernel: tpu_custom_call.1
= control target key start
LH: loop header
LB: loop body
LE: loop exit
PB: predicated region body
PF: predicated region fallthrough
CT: control target
= control target key end

     0   :  { %12 = vsyncpa [#allocation3], 0  ;;  %s1165_s24 = smov 0   ;;  %s1309_s0 = inlined_call_operand.vmem [shape: f32[24,64], index: 0, kind: input, shape index: {}]   ;;  %s1310_s1 = inlined_call_operand.vmem [shape: bf16[64,256], index: 1, kind: input, shape index: {}]   ;;  %s1311_s2 = inlined_call_operand.vmem [shape: f32[1,256], index: 2, kind: input, shape index: {}]   ;;  %s1312_s3 = inlined_call_operand.hbm [shape: bf16[256,256], index: 3, kind: input, shape index: {}]   ;;  %s1313_s4 = inlined_call_operand.vmem [shape: f32[1,256], index: 4, kind: input, shape index: {}]   ;;  %s1314_s5 = inlined_call_operand.vmem [shape: bf16[256,16], index: 5, kind: input, shape index: {}]   ;;  %s1315_s6 = inlined_call_operand.vmem [shape: f32[1,16], index: 6, kind: input, shape index: {}]   ;;  %s1316_s7 = inlined_call_operand.vmem [shape: f32[24,16], index: 7, kind: output, shape index: {}]  }
   0x1 LB: > { %s1171_s25 = sadd.s32 4294967295, %s1119_s24   ;;  %p894_p0 = scmp.ge.s32.totalorder %s1119_s24, 1  ;;  %s1119_s24 = sphi %s1165_s24, %s18_s24  }
   0x2   : > { %p201_p1 = scmp.lt.s32.totalorder %s1119_s24, 4  ;;  %s1121_s26 = smov [#allocation2]  }
   0x3   : > { %s219_s27 = sshll.u32 %s1121_s26, 4  ;;  %p1317_p3 = scmp.eq.s32.totalorder %s1171_s25, 0  ;;  %s220_s27 = int_to_ptr.vmem [resolvable:$true] %s219_s27 }
   0x4   : > { %p1175_p2 = pnand %p894_p0, %p201_p1  ;;  %s1081_s9 = scalar_lea.hbm %s1312_s3, 4096 }
   0x5   : > { %p1082_p6 = scmp.ne.s32.totalorder %s1312_s3, %s1081_s9  ;;  %p1088_p10 = scmp.lt.u32.totalorder %s1081_s9, %s1312_s3 }
   0x6   : > { %s1319_s28 = scalar_select %p1175_p2, 1, 0 }
   0x7   : > { %p987_p4 = pneg %p1175_p2 }
   0x9   : > { %p1184_p5 = pnand %p1317_p3, %p987_p4 }
   0xb   : > { %p1083_p7 = pneg %p1184_p5 }
   0xd   : > { %p1084_p8 = pnand %p1083_p7, %p1082_p6 }
   0xf   : > { %p1085_p9 = pneg %p1084_p8 }
  0x11   : > { %p1090_p11 = pnand %p1088_p10, %p1085_p9 }
  0x13   : > { %1093 = shalt.err (!%p1090_p11)
}
  0x14   : > { %s1094_s14 = scalar_lea.vmem %s220_s27, 4096  ;;  %p1102_p1 = scmp.lt.s32.totalorder %s220_s27, %s220_s27 }
  0x15   : > { %p1095_p12 = scmp.ne.s32.totalorder %s220_s27, %s1094_s14  ;;  %p1103_p4 = scmp.lt.s32.totalorder %s1094_s14, %s1094_s14 }
  0x17   : > { %p1097_p13 = pnand %p1095_p12, %p1083_p7  ;;  %p1104_p3 = por %p1103_p4, %p1102_p1 }
  0x19   : > { %p1098_p0 = pneg %p1097_p13 }
  0x1b   : > { %p1105_p2 = pnand %p1104_p3, %p1098_p0 }
  0x1d   : > { %1108 = shalt.err (!%p1105_p2)
}
  0x1e   : > { %s1122_s15 = smov 128   ;;  %s1123_s16 = smov 8  }
  0x1f   : > { %990 = dma.hbm_to_vmem [thread:$0]  (!%p1184_p5), %s1312_s3, 4096, %s220_s27, [#allocation3], %s1122_s15, %s1122_s15, %s1123_s16  }
  0x20   : > { %p1321_p6 = scmp.ne.s32.totalorder %s1319_s28, 0 }
  0x21   : > { %p1322_p8 = scmp.eq.s32.totalorder (!%p1321_p6), %s1171_s25, 0 }
  0x22   : > { %251 = sbr.rel (%p1321_p6) target bundleno = 717 (0x2cd), region = 48 }
  0x29   : > { %1114 = dma.done.wait (%p1322_p8), [#allocation3], 4096   ;;  %p1323_p7 = pmov %p1322_p8 }
  0x2a   : > { %v1124_v0 = vmov 0   ;;  %p281_p2 = scmp.lt.s32.totalorder %s1171_s25, 2  ;;  %v1005_v1 = vld [vmem:[%s1310_s1 + $0x4] ss:$8 sps:$4 sm:$0xff]   ;;  %v1007_v2 = vld [vmem:[%s1310_s1] ss:$8 sps:$4 sm:$0xff]   ;;  %v302_v55 = vlaneseq }
  0x2b   : > { %1116 = vsyncadd (%p1323_p7), [#allocation3], 4294963200  ;;  %388 = vmatprep.mubr.bf16.mxu0 %v1124_v0  ;;  %356 = vmatprep.subr.bf16.mxu0 %v1005_v1  ;;  %v1008_v3 = vld [vmem:[%s1310_s1 + $0x14] ss:$8 sps:$4 sm:$0xff]   ;;  %v1010_v4 = vld [vmem:[%s1310_s1 + $0x10] ss:$8 sps:$4 sm:$0xff]  }
  0x2c   : > { %s1325_s25 = smov (!%p281_p2, %s1171_s25), 2  ;;  %357 = vmatpush1.bf16.msra.mxu0 %v1007_v2  ;;  %v1011_v5 = vld [vmem:[%s1310_s1 + $0x24] ss:$8 sps:$4 sm:$0xff]   ;;  %v1013_v6 = vld [vmem:[%s1310_s1 + $0x20] ss:$8 sps:$4 sm:$0xff]   ;;  %vm352_vm0 = vcmask 523264  }
  0x2d   : > { %358 = vmatprep.subr.bf16.mxu0 %v1008_v3  ;;  %s899_s10 = sshll.u32 %s1325_s25, 3  ;;  %v1017_v7 = vld [vmem:[#allocation2 + $0x4] ss:$8 sps:$4 sm:$0xff]   ;;  %v1019_v8 = vld [vmem:[#allocation2] ss:$8 sps:$4 sm:$0xff]   ;;  %v1069_v47 = vld [vmem:[%s1314_s5 + $0x50] sm:$0xff]  }
  0x2e   : > { %v1020_v9 = vld [vmem:[#allocation2 + $0x14] ss:$8 sps:$4 sm:$0xff]   ;;  %s284_s15 = scalar_lea.vmem %s1309_s0, %s899_s10  ;;  %605 = vmatprep.subr.bf16.mxu1 %v1017_v7  ;;  %v1022_v11 = vld [vmem:[#allocation2 + $0x10] ss:$8 sps:$4 sm:$0xff]   ;;  %v1023_v13 = vld [vmem:[#allocation2 + $0x24] ss:$8 sps:$4 sm:$0xff]   ;;  %s288_s18 = scalar_lea.vmem %s1316_s7, %s899_s10 }
  0x2f   : > { %v1014_v10 = vld [vmem:[%s1310_s1 + $0x34] ss:$8 sps:$4 sm:$0xff]   ;;  %606 = vmatpush1.bf16.msra.mxu1 %v1019_v8  ;;  %v1016_v12 = vld [vmem:[%s1310_s1 + $0x30] ss:$8 sps:$4 sm:$0xff]   ;;  %v290_v14 = vld [vmem:[%s284_s15] sm:$0xff]  ;;  %v303_v56 = vshrl.u32 %v302_v55, 7 }
  0x30   : > { %359 = vmatpush1.bf16.msra.mxu0 %v1010_v4  ;;  %607 = vmatprep.subr.bf16.mxu1 %v1020_v9  ;;  %v1025_v15 = vld [vmem:[#allocation2 + $0x20] ss:$8 sps:$4 sm:$0xff]   ;;  %v291_v16 = vpack.c.bf16 %v290_v14, %v290_v14  ;;  %v1026_v17 = vld [vmem:[#allocation2 + $0x34] ss:$8 sps:$4 sm:$0xff]   ;;  %v1028_v18 = vld [vmem:[#allocation2 + $0x30] ss:$8 sps:$4 sm:$0xff]  }
  0x31   : > { %360 = vmatprep.subr.bf16.mxu0 %v1011_v5  ;;  %v1029_v19 = vld [vmem:[#allocation2 + $0x44] ss:$8 sps:$4 sm:$0xff]   ;;  %v1031_v20 = vld [vmem:[#allocation2 + $0x40] ss:$8 sps:$4 sm:$0xff]   ;;  %v1032_v21 = vld [vmem:[#allocation2 + $0x54] ss:$8 sps:$4 sm:$0xff]  }
  0x32   : > { %v1034_v22 = vld [vmem:[#allocation2 + $0x50] ss:$8 sps:$4 sm:$0xff]   ;;  %v1035_v23 = vld [vmem:[#allocation2 + $0x64] ss:$8 sps:$4 sm:$0xff]   ;;  %v1037_v24 = vld [vmem:[#allocation2 + $0x60] ss:$8 sps:$4 sm:$0xff]  }
  0x33   : > { %608 = vmatpush1.bf16.msra.mxu1 %v1022_v11  ;;  %v1038_v25 = vld [vmem:[#allocation2 + $0x74] ss:$8 sps:$4 sm:$0xff]   ;;  %v1040_v26 = vld [vmem:[#allocation2 + $0x70] ss:$8 sps:$4 sm:$0xff]   ;;  %v1041_v27 = vld [vmem:[#allocation2 + $0x84] ss:$8 sps:$4 sm:$0xff]  }
  0x34   : > { %361 = vmatpush1.bf16.msra.mxu0 %v1013_v6  ;;  %609 = vmatprep.subr.bf16.mxu1 %v1023_v13  ;;  %v1043_v28 = vld [vmem:[#allocation2 + $0x80] ss:$8 sps:$4 sm:$0xff]   ;;  %v1044_v29 = vld [vmem:[#allocation2 + $0x94] ss:$8 sps:$4 sm:$0xff]   ;;  %v1046_v30 = vld [vmem:[#allocation2 + $0x90] ss:$8 sps:$4 sm:$0xff]  }
  0x35   : > { %362 = vmatprep.subr.bf16.mxu0 %v1014_v10  ;;  %v1047_v31 = vld [vmem:[#allocation2 + $0xa4] ss:$8 sps:$4 sm:$0xff]   ;;  %v1049_v32 = vld [vmem:[#allocation2 + $0xa0] ss:$8 sps:$4 sm:$0xff]   ;;  %v1050_v33 = vld [vmem:[#allocation2 + $0xb4] ss:$8 sps:$4 sm:$0xff]  }
  0x36   : > { %v1052_v34 = vld [vmem:[#allocation2 + $0xb0] ss:$8 sps:$4 sm:$0xff]   ;;  %v1053_v35 = vld [vmem:[#allocation2 + $0xc4] ss:$8 sps:$4 sm:$0xff]   ;;  %v1055_v36 = vld [vmem:[#allocation2 + $0xc0] ss:$8 sps:$4 sm:$0xff]  }
  0x37   : > { %610 = vmatpush1.bf16.msra.mxu1 %v1025_v15  ;;  %v1056_v37 = vld [vmem:[#allocation2 + $0xd4] ss:$8 sps:$4 sm:$0xff]   ;;  %v1058_v38 = vld [vmem:[#allocation2 + $0xd0] ss:$8 sps:$4 sm:$0xff]   ;;  %v1059_v39 = vld [vmem:[#allocation2 + $0xe4] ss:$8 sps:$4 sm:$0xff]  }
  0x38   : > { %363 = vmatpush1.bf16.msra.mxu0 %v1016_v12  ;;  %611 = vmatprep.subr.bf16.mxu1 %v1026_v17  ;;  %v1061_v40 = vld [vmem:[#allocation2 + $0xe0] ss:$8 sps:$4 sm:$0xff]   ;;  %v1062_v41 = vld [vmem:[#allocation2 + $0xf4] ss:$8 sps:$4 sm:$0xff]   ;;  %v1064_v42 = vld [vmem:[#allocation2 + $0xf0] ss:$8 sps:$4 sm:$0xff]  }
  0x39   : > { %v1065_v43 = vld [vmem:[%s1314_s5 + $0x40] sm:$0xff]   ;;  %v1067_v45 = vld [vmem:[%s1314_s5 + $0x48] sm:$0xff]   ;;  %v1070_v48 = vld [vmem:[%s1314_s5 + $0x10] sm:$0xff]   ;;  %v304_v57 = vsub.s32 0, %v303_v56  ;;  %v308_v59 = vsub.s32 1, %v303_v56  ;;  %vm825_vm1 = vcmask 130048  }
  0x3a   : > { %v1066_v44 = vld [vmem:[%s1314_s5] sm:$0xff]   ;;  %961 = vmatprep.subr.bf16.mxu0 %v1065_v43  ;;  %v1068_v46 = vld [vmem:[%s1314_s5 + $0x8] sm:$0xff]   ;;  %v1071_v49 = vld [vmem:[%s1314_s5 + $0x58] sm:$0xff]  }
  0x3b   : > { %909 = vmatmul.mubr.msk.bf16.vlgmr.msra.gmra.mrb[0].mxu0 %vm352_vm0, %v291_v16  ;;  %612 = vmatpush1.bf16.msra.mxu1 %v1028_v18  ;;  %v1072_v50 = vld [vmem:[%s1314_s5 + $0x18] sm:$0xff]   ;;  %v1073_v51 = vld [vmem:[%s1314_s5 + $0x60] sm:$0xff]   ;;  %v1075_v53 = vld [vmem:[%s1314_s5 + $0x68] sm:$0xff]  }
  0x3c   : > { %613 = vmatprep.subr.bf16.mxu1 %v1029_v19  ;;  %962 = vmatpush3.bf16.msra.mxu0 %v1066_v44  ;;  %v1074_v52 = vld [vmem:[%s1314_s5 + $0x20] sm:$0xff]   ;;  %v1076_v54 = vld [vmem:[%s1314_s5 + $0x28] sm:$0xff]   ;;  %v1077_v8 = vld [vmem:[%s1314_s5 + $0x70] sm:$0xff]  }
  0x3d   : > { %963 = vmatprep.subr.bf16.mxu0 %v1067_v45  ;;  %v300_v58 = vld [vmem:[%s1311_s2] sm:$0x3]  ;;  %v1078_v9 = vld [vmem:[%s1314_s5 + $0x30] sm:$0xff]   ;;  %v1079_v10 = vld [vmem:[%s1314_s5 + $0x78] sm:$0xff]  }
  0x3e   : > { %v305_v60 = vrot.slane %v300_v58, %v304_v57  ;;  %v309_v61 = vrot.slane %v300_v58, %v308_v59  ;;  %v1080_v11 = vld [vmem:[%s1314_s5 + $0x38] sm:$0xff]   ;;  %v433_v12 = vld [vmem:[%s1313_s4] sm:$0x3] }
  0x3f   : > { %614 = vmatpush1.bf16.msra.mxu1 %v1031_v20  ;;  %v438_v13 = vrot.slane %v433_v12, %v304_v57  ;;  %v442_v14 = vrot.slane %v433_v12, %v308_v59 }
  0x40   : > { %615 = vmatprep.subr.bf16.mxu1 %v1032_v21  ;;  %964 = vmatpush3.bf16.msra.mxu0 %v1068_v46 }
  0x41   : > { %965 = vmatprep.subr.bf16.mxu0 %v1069_v47 }
  0x43   : > { %616 = vmatpush1.bf16.msra.mxu1 %v1034_v22 }
  0x44   : > { %617 = vmatprep.subr.bf16.mxu1 %v1035_v23  ;;  %966 = vmatpush3.bf16.msra.mxu0 %v1070_v48 }
  0x45   : > { %967 = vmatprep.subr.bf16.mxu0 %v1071_v49 }
  0x47   : > { %618 = vmatpush1.bf16.msra.mxu1 %v1037_v24 }
  0x48   : > { %619 = vmatprep.subr.bf16.mxu1 %v1038_v25  ;;  %968 = vmatpush3.bf16.msra.mxu0 %v1072_v50 }
  0x49   : > { %969 = vmatprep.subr.bf16.mxu0 %v1073_v51 }
  0x4b   : > { %620 = vmatpush1.bf16.msra.mxu1 %v1040_v26  ;;  %v942_v26 = vld [vmem:[%s1315_s6] ss:$0 sm:$0xff] }
  0x4c   : > { %621 = vmatprep.subr.bf16.mxu1 %v1041_v27  ;;  %970 = vmatpush3.bf16.msra.mxu0 %v1074_v52 }
  0x4d   : > { %971 = vmatprep.subr.bf16.mxu0 %v1075_v53 }
  0x4f   : > { %622 = vmatpush1.bf16.msra.mxu1 %v1043_v28 }
  0x50   : > { %623 = vmatprep.subr.bf16.mxu1 %v1044_v29  ;;  %972 = vmatpush3.bf16.msra.mxu0 %v1076_v54 }
  0x51   : > { %973 = vmatprep.subr.bf16.mxu0 %v1077_v8 }
  0x53   : > { %624 = vmatpush1.bf16.msra.mxu1 %v1046_v30 }
  0x54   : > { %625 = vmatprep.subr.bf16.mxu1 %v1047_v31  ;;  %974 = vmatpush3.bf16.msra.mxu0 %v1078_v9 }
  0x55   : > { %975 = vmatprep.subr.bf16.mxu0 %v1079_v10 }
  0x57   : > { %626 = vmatpush1.bf16.msra.mxu1 %v1049_v32 }
  0x58   : > { %627 = vmatprep.subr.bf16.mxu1 %v1050_v33  ;;  %976 = vmatpush3.bf16.msra.mxu0 %v1080_v11 }
  0x5b   : > { %628 = vmatpush1.bf16.msra.mxu1 %v1052_v34 }
  0x5c   : > { %629 = vmatprep.subr.bf16.mxu1 %v1053_v35 }
  0x5f   : > { %630 = vmatpush1.bf16.msra.mxu1 %v1055_v36 }
  0x60   : > { %631 = vmatprep.subr.bf16.mxu1 %v1056_v37 }
  0x63   : > { %632 = vmatpush1.bf16.msra.mxu1 %v1058_v38 }
  0x64   : > { %633 = vmatprep.subr.bf16.mxu1 %v1059_v39 }
  0x67   : > { %634 = vmatpush1.bf16.msra.mxu1 %v1061_v40 }
  0x68   : > { %635 = vmatprep.subr.bf16.mxu1 %v1062_v41 }
  0x6b   : > { %636 = vmatpush1.bf16.msra.mxu1 %v1064_v42 }
 0x10e   : > { %v390_v62 = vpop.f32.mrb[0].mxu0 }
 0x10f   : > { %v391_v63 = vadd.f32 %v390_v62, %v305_v60  ;;  %v392_v0 = vpop.f32.mrb[1].mxu0 }
 0x110   : > { %v393_v1 = vadd.f32 %v392_v0, %v309_v61  ;;  %v394_v2 = vpop.f32.mrb[2].mxu0 }
 0x111   : > { %v397_v3 = vmax.f32 %v391_v63, 0.0  ;;  %v395_v4 = vpop.f32.mrb[3].mxu0 }
 0x112   : > { %v398_v5 = vmax.f32 %v393_v1, 0.0 }
 0x113   : > { %v399_v7 = vpack.c.bf16 %v397_v3, %v397_v3 }
 0x114   : > { %v400_v6 = vpack.c.bf16 %v398_v5, %v398_v5 }
 0x116   : > { %637 = vmatprep.mubr.bf16.mxu1 %v400_v6 }
 0x117   : > { %638 = vmatmul.mubr.bf16.vlgmr.msra.gmra.mrb[0].mxu1 %v399_v7 }
 0x1ea   : > { %v639_v15 = vpop.f32.mrb[0].mxu1 }
 0x1eb   : > { %v640_v16 = vadd.f32 %v639_v15, %v438_v13  ;;  %v641_v17 = vpop.f32.mrb[1].mxu1 }
 0x1ec   : > { %v642_v18 = vadd.f32 %v641_v17, %v442_v14  ;;  %v643_v19 = vpop.f32.mrb[2].mxu1 }
 0x1ed   : > { %v646_v20 = vmax.f32 %v640_v16, 0.0  ;;  %v644_v21 = vpop.f32.mrb[3].mxu1 }
 0x1ee   : > { %v647_v22 = vmax.f32 %v642_v18, 0.0 }
 0x1ef   : > { %v648_v24 = vpack.c.bf16 %v646_v20, %v646_v20 }
 0x1f0   : > { %v649_v23 = vpack.c.bf16 %v647_v22, %v647_v22 }
 0x1f2   : > { %817 = vmatprep.mubr.bf16.mxu0 %v649_v23 }
 0x1f3   : > { %818 = vmatmul.mubr.bf16.vlgmr.msra.gmra.mrb[4].mxu0 %v648_v24 }
 0x2c6   : > { %v977_v25 = vpop.f32.mrb[4].mxu0 }
 0x2c7   : > { %v978_v27 = vpop.f32.mrb[5].mxu0 }
 0x2c8   : > { %v979_v28 = vadd.f32 %v978_v27, %v977_v25  ;;  %v980_v29 = vpop.f32.mrb[6].mxu0 }
 0x2c9   : > { %v981_v30 = vpop.f32.mrb[7].mxu0 }
 0x2ca   : > { %v820_v31 = vadd.f32 %v979_v28, %v942_v26 }
 0x2cc   : > { %826 = vst.msk [vmem:[%s288_s18] sm:$0xff] %vm825_vm1, %v820_v31 }
 0x2cd PF: > { %s18_s24 = sadd.s32 1, %s1119_s24  }
 0x2ce   : > { %p15_p3 = scmp.ge.s32.totalorder %s18_s24, 5  }
 0x2d0   :  { %17 = sbr.rel (!%p15_p3) target bundleno = 1 (0x1), region = 83 }
 0x2d7   :  { %846 = vsyncpa [#allocation3], 1 }
 0x2d8   :  { %848 = vsyncpa [#allocation3 + $0x1], 1 }

</bundles_post_ra>
